<compile_context>
chip_gen: v6e
topology: v6e:2x2x1
jax: 0.10.0
libtpu: 0.0.40
codegen_flags: <defaults>
</compile_context>

<pallas_src>
import functools

import jax
import jax.numpy as jnp
from jax import lax
from jax.experimental import pallas as pl
from jax.experimental.pallas import tpu as pltpu


def _round_up(x: int, m: int) -> int:
    return ((x + m - 1) // m) * m


def _cdiv(a: int, b: int) -> int:
    return (a + b - 1) // b


# ----------------------------------------------------------------------------
# Feature probe: is single-buffering (pl.Buffered(1)) of constant blocks OK?
# ----------------------------------------------------------------------------
@functools.lru_cache(maxsize=1)
def _single_buffer_consts_supported() -> bool:
    if not hasattr(pl, "Buffered"):
        return False
    try:
        def _k(x_ref, o_ref):
            o_ref[...] = x_ref[...] + 1.0

        f = pl.pallas_call(
            _k,
            out_shape=jax.ShapeDtypeStruct((8, 128), jnp.float32),
            grid=(2,),
            in_specs=[pl.BlockSpec((8, 128), lambda i: (0, 0),
                                   pipeline_mode=pl.Buffered(1))],
            out_specs=pl.BlockSpec((8, 128), lambda i: (0, 0)),
        )
        jax.block_until_ready(f(jnp.zeros((8, 128), jnp.float32)))
        return True
    except Exception:
        return False


# ----------------------------------------------------------------------------
# Pallas kernel: token-tiled projection  out = x @ W + b   (f32 accumulation)
# ----------------------------------------------------------------------------
def _patch_proj_kernel(x_ref, w_ref, b_ref, o_ref):
    # x_ref: (TM, Kp)  w_ref: (Kp, TN)  b_ref: (1, TN) f32  o_ref: (TM, TN)
    acc = jnp.dot(x_ref[...], w_ref[...], preferred_element_type=jnp.float32)
    o_ref[...] = (acc + b_ref[...]).astype(o_ref.dtype)


def _pick_tm(M: int, tm_max: int) -> int:
    """Row tile: prefer a divisor of M (no pad rows / no output unpad copy)."""
    if M % 8 == 0 and M > tm_max:
        hi = tm_max - (tm_max % 8)
        lo = max(tm_max // 2, 8)
        for cand in range(hi, lo - 1, -8):
            if M % cand == 0:
                return cand
    return min(tm_max, _round_up(M, 8))


def patch_proj_pallas(x2d: jax.Array, w: jax.Array, b: jax.Array,
                      *, out_dtype=None, tm_max: int = 512,
                      single_buffer_consts: bool = False) -> jax.Array:
    """x2d: [M, K] patch tokens; w: [K, D]; b: [D] f32 -> [M, D] in out_dtype."""
    M, K = x2d.shape
    K2, D = w.shape
    assert K == K2, "weight rows must match patch feature size"
    out_dtype = out_dtype or x2d.dtype

    # ---- row tile -----------------------------------------------------------
    tm = _pick_tm(M, tm_max)
    M_pad = _round_up(M, tm)
    if M_pad // tm < 2 and M > 8:
        # Guarantee >= 2 row-grid steps so "parallel" can shard across v7x's
        # two TensorCores (harmless on single-TC v5e/v6e).
        tm = _round_up(_cdiv(M, 2), 8)
        M_pad = _round_up(M, tm)

    # Lane-dense K and D (multiples of 128): unmasked vector loads/stores.
    K_pad = _round_up(K, 128)
    D_pad = _round_up(D, 128)

    itm_x = jnp.dtype(x2d.dtype).itemsize
    itm_w = jnp.dtype(w.dtype).itemsize
    itm_o = jnp.dtype(out_dtype).itemsize

    def vmem_bytes(tn: int, w_bufs: int) -> int:
        return (2 * tm * K_pad * itm_x          # x row tiles (double-buffered)
                + w_bufs * K_pad * tn * itm_w   # weight tile
                + 2 * tm * tn * itm_o           # output tiles (double-buffered)
                + w_bufs * 8 * tn * 4)          # bias tile (f32, 8-sublane pad)

    VMEM_TARGET = 40 * 1024 * 1024              # headroom under v7x's 64 MiB
    w_bufs_const = 1 if single_buffer_consts else 2
    if vmem_bytes(D_pad, w_bufs_const) <= VMEM_TARGET:
        tn = D_pad
    else:
        # Fallback: tile D so the (double-buffered) weight tile + row tiles fit.
        tn = 128
        for cand in range(D_pad, 127, -128):
            if D_pad % cand == 0 and vmem_bytes(cand, 2) <= VMEM_TARGET:
                tn = cand
                break
    n_d = D_pad // tn
    n_m = M_pad // tm
    # Single-buffer the weight/bias only when their block truly never changes.
    use_single_buf = single_buffer_consts and n_d == 1

    # ---- padding (skipped entirely when shapes already conform) -------------
    x_p = x2d if (M_pad == M and K_pad == K) else jnp.pad(
        x2d, ((0, M_pad - M), (0, K_pad - K)))
    w_p = w if (K_pad == K and D_pad == D) else jnp.pad(
        w, ((0, K_pad - K), (0, D_pad - D)))
    b32 = b.astype(jnp.float32)
    b_p = (b32 if D_pad == D else jnp.pad(b32, (0, D_pad - D))).reshape(1, D_pad)

    if use_single_buf:
        w_spec = pl.BlockSpec((K_pad, tn), lambda j, i: (0, j),
                              pipeline_mode=pl.Buffered(1))
        b_spec = pl.BlockSpec((1, tn), lambda j, i: (0, j),
                              pipeline_mode=pl.Buffered(1))
    else:
        w_spec = pl.BlockSpec((K_pad, tn), lambda j, i: (0, j))
        b_spec = pl.BlockSpec((1, tn), lambda j, i: (0, j))

    vmem_needed = vmem_bytes(tn, 1 if use_single_buf else 2)
    vmem_limit = int(min(max(vmem_needed * 3 // 2 + 4 * 1024 * 1024,
                             16 * 1024 * 1024),
                         48 * 1024 * 1024))

    out = pl.pallas_call(
        _patch_proj_kernel,
        out_shape=jax.ShapeDtypeStruct((M_pad, D_pad), out_dtype),
        grid_spec=pltpu.PrefetchScalarGridSpec(
            num_scalar_prefetch=0,
            grid=(n_d, n_m),                    # D tiles outer (usually 1), rows inner
            in_specs=[
                pl.BlockSpec((tm, K_pad), lambda j, i: (i, 0)),  # token rows
                w_spec,                                           # weight (VMEM-resident)
                b_spec,                                           # bias (f32)
            ],
            out_specs=pl.BlockSpec((tm, tn), lambda j, i: (i, j)),
        ),
        compiler_params=pltpu.CompilerParams(
            dimension_semantics=("parallel", "parallel"),
            vmem_limit_bytes=vmem_limit,
        ),
    )(x_p, w_p, b_p)

    if M_pad != M or D_pad != D:
        out = out[:M, :D]
    return out


# ----------------------------------------------------------------------------
# Module-equivalent wrapper: Conv2DPatchEmbed.forward
# ----------------------------------------------------------------------------
@functools.partial(jax.jit, static_argnames=(
    "patch_size", "compute_dtype", "out_dtype", "single_buffer_consts"))
def _conv2d_patch_embed_impl(x, w_conv, b_conv, *, patch_size, compute_dtype,
                             out_dtype, single_buffer_consts):
    B, C, H, W = x.shape
    P = patch_size
    Hp, Wp = H // P, W // P
    N = Hp * Wp
    D = w_conv.shape[0]
    K = C * P * P
    out_dtype = out_dtype or x.dtype
    cdt = compute_dtype or x.dtype

    # Cast first so the im2col copy below moves compute-dtype (bf16) bytes.
    xs = x.astype(cdt)

    # im2col for stride==kernel conv: regular-grid space-to-depth.
    # Row feature order is (c, ky, kx), matching w_conv.reshape(D, C*P*P).
    # TODO(synk): fuse this space-to-depth into the pallas_call to remove the
    #             extra activation HBM round trip.
    patches = xs.reshape(B, C, Hp, P, Wp, P)
    patches = jnp.transpose(patches, (0, 2, 4, 1, 3, 5))   # (B, Hp, Wp, C, P, P)
    patches = patches.reshape(B * N, K)

    # TODO(synk): cache this weight re-layout across forward calls.
    w2d = w_conv.reshape(D, K).T.astype(cdt)                # (K, D)
    b32 = b_conv.astype(jnp.float32)

    tokens = patch_proj_pallas(patches, w2d, b32, out_dtype=out_dtype,
                               single_buffer_consts=single_buffer_consts)
    # norm_layer=None -> nn.Identity(), so no norm is applied.
    return tokens.reshape(B, N, D)


def conv2d_patch_embed(x, w_conv, b_conv, *, patch_size: int,
                       compute_dtype=jnp.bfloat16, out_dtype=None):
    """x: [B, C, H, W] (NCHW); w_conv: [D, C, P, P] (PyTorch OIHW); b_conv: [D].
    Returns tokens [B, N, D] with N = (H//P)*(W//P)."""
    return _conv2d_patch_embed_impl(
        x, w_conv, b_conv, patch_size=patch_size, compute_dtype=compute_dtype,
        out_dtype=out_dtype,
        single_buffer_consts=_single_buffer_consts_supported())


# ----------------------------------------------------------------------------
# Demo / smoke test
# ----------------------------------------------------------------------------
if __name__ == "__main__":
    # Small shapes consistent with the module: img_size=16, patch_size=4,
    # in_chans=4, embed_dim=32  =>  N = (16/4)^2 = 16, K = 4*4*4 = 64.
    B, C, H, W = 2, 4, 16, 16
    patch_size = 4
    embed_dim = 32
    K = C * patch_size * patch_size

    root = jax.random.PRNGKey(0)
    k_x, k_w, k_b = jax.random.split(root, 3)

    x = jax.random.normal(k_x, (B, C, H, W), dtype=jnp.float32)

    # Deterministic nn.Conv2d-style init: U(-1/sqrt(fan_in), 1/sqrt(fan_in)).
    bound = 1.0 / (K ** 0.5)
    w_conv = jax.random.uniform(
        k_w, (embed_dim, C, patch_size, patch_size), jnp.float32, -bound, bound)
    b_conv = jax.random.uniform(k_b, (embed_dim,), jnp.float32, -bound, bound)

    # Reference: full-precision strided conv (== nn.Conv2d kernel=stride=P)
    # + flatten(2).transpose(1, 2).
    ref = lax.conv_general_dilated(
        x, w_conv, window_strides=(patch_size, patch_size), padding="VALID",
        dimension_numbers=("NCHW", "OIHW", "NCHW"),
        precision=lax.Precision.HIGHEST)
    ref = ref + b_conv[None, :, None, None]
    ref = jnp.transpose(ref.reshape(B, embed_dim, -1), (0, 2, 1))   # [B, N, D]
    N = (H // patch_size) * (W // patch_size)

    # Default path: bf16 compute stream, f32 accumulation, f32 output.
    tokens = conv2d_patch_embed(x, w_conv, b_conv, patch_size=patch_size)
    jax.block_until_ready(tokens)
    assert tokens.shape == (B, N, embed_dim)
    assert jnp.allclose(tokens, ref, atol=5e-2, rtol=5e-2)

    # f32 compute path (tight check of the math).
    tokens_f32 = conv2d_patch_embed(
        x, w_conv, b_conv, patch_size=patch_size, compute_dtype=jnp.float32)
    jax.block_until_ready(tokens_f32)
    assert jnp.allclose(tokens_f32, ref, atol=1e-3, rtol=1e-3)

    # bf16 output path (halved writeback bytes for downstream bf16 consumers).
    tokens_bf16 = conv2d_patch_embed(
        x, w_conv, b_conv, patch_size=patch_size, out_dtype=jnp.bfloat16)
    jax.block_until_ready(tokens_bf16)
    assert tokens_bf16.dtype == jnp.bfloat16
    assert jnp.allclose(tokens_bf16.astype(jnp.float32), ref, atol=5e-2, rtol=5e-2)

    print("KERNEL_OK")
</pallas_src>

<mosaic_0001>
module attributes {stable_mosaic.version = 11 : i64} {
  func.func @_k(%arg0: i32, %arg1: memref<8x128xf32, #tpu.memory_space<vmem>>, %arg2: memref<8x128xf32, #tpu.memory_space<vmem>>) attributes {dimension_semantics = [#tpu.dimension_semantics<arbitrary>], iteration_bounds = array<i64: 2>, scalar_prefetch = 0 : i64, scratch_operands = 0 : i64, tpu.core_type = #tpu.core_type<tc>, window_params = [{pipeline_mode = #tpu.pipeline_mode<synchronous>, transform_indices = @transform_0, window_bounds = array<i64: 8, 128>}, {pipeline_mode = #tpu.pipeline_mode<synchronous>, transform_indices = @transform_1, window_bounds = array<i64: 8, 128>}]} {
    %c0 = arith.constant 0 : index
    %c0_0 = arith.constant 0 : index
    %0 = vector.load %arg1[%c0, %c0_0] : memref<8x128xf32, #tpu.memory_space<vmem>>, vector<8x128xf32>
    %cst = arith.constant 1.000000e+00 : f32
    %1 = vector.broadcast %cst : f32 to vector<8x128xf32>
    %2 = arith.addf %0, %1 : vector<8x128xf32>
    %c0_1 = arith.constant 0 : index
    %c0_2 = arith.constant 0 : index
    %3 = vector.load %arg2[%c0_1, %c0_2] : memref<8x128xf32, #tpu.memory_space<vmem>>, vector<8x128xf32>
    tpu.vector_store %arg2[%c0_1, %c0_2], %2 {strides = array<i32>} : memref<8x128xf32, #tpu.memory_space<vmem>>, vector<8x128xf32>,
    return
  }
  func.func @transform_0(%arg0: i32) -> (i32, i32) {
    %c0_i32 = arith.constant 0 : i32
    %c0_i32_0 = arith.constant 0 : i32
    %c0_i32_1 = arith.constant 0 : i32
    return %c0_i32, %c0_i32_0 : i32, i32
  }
  func.func @transform_1(%arg0: i32) -> (i32, i32) {
    %c0_i32 = arith.constant 0 : i32
    %c0_i32_0 = arith.constant 0 : i32
    %c0_i32_1 = arith.constant 0 : i32
    return %c0_i32, %c0_i32_0 : i32, i32
  }
}

module attributes {stable_mosaic.version = 11 : i64} {
  func.func @_patch_proj_kernel(%arg0: i32, %arg1: i32, %arg2: memref<16x128xbf16, #tpu.memory_space<vmem>>, %arg3: memref<128x128xbf16, #tpu.memory_space<vmem>>, %arg4: memref<1x128xf32, #tpu.memory_space<vmem>>, %arg5: memref<16x128xf32, #tpu.memory_space<vmem>>) attributes {dimension_semantics = [#tpu.dimension_semantics<parallel>, #tpu.dimension_semantics<parallel>], iteration_bounds = array<i64: 1, 2>, scalar_prefetch = 0 : i64, scratch_operands = 0 : i64, tpu.core_type = #tpu.core_type<tc>, window_params = [{transform_indices = @transform_0, window_bounds = array<i64: 16, 128>}, {transform_indices = @transform_1, window_bounds = array<i64: 128, 128>}, {transform_indices = @transform_2, window_bounds = array<i64: 1, 128>}, {transform_indices = @transform_3, window_bounds = array<i64: 16, 128>}]} {
    %c0 = arith.constant 0 : index
    %c0_0 = arith.constant 0 : index
    %0 = vector.load %arg2[%c0, %c0_0] : memref<16x128xbf16, #tpu.memory_space<vmem>>, vector<16x128xbf16>
    %c0_1 = arith.constant 0 : index
    %c0_2 = arith.constant 0 : index
    %1 = vector.load %arg3[%c0_1, %c0_2] : memref<128x128xbf16, #tpu.memory_space<vmem>>, vector<128x128xbf16>
    %cst = arith.constant dense<0.000000e+00> : vector<16x128xf32>
    %2 = tpu.matmul %0, %1, %cst {dimension_numbers = #tpu.dot_dimension_numbers<[1], [0], [0], [1], [0, 0, 1, 1], [], []>} : vector<16x128xbf16>, vector<128x128xbf16>, vector<16x128xf32> -> vector<16x128xf32>
    %c0_3 = arith.constant 0 : index
    %c0_4 = arith.constant 0 : index
    %3 = vector.load %arg4[%c0_3, %c0_4] : memref<1x128xf32, #tpu.memory_space<vmem>>, vector<1x128xf32>
    %4 = vector.broadcast %3 : vector<1x128xf32> to vector<16x128xf32>
    %5 = arith.addf %2, %4 : vector<16x128xf32>
    %c0_5 = arith.constant 0 : index
    %c0_6 = arith.constant 0 : index
    %6 = vector.load %arg5[%c0_5, %c0_6] : memref<16x128xf32, #tpu.memory_space<vmem>>, vector<16x128xf32>
    tpu.vector_store %arg5[%c0_5, %c0_6], %5 {strides = array<i32>} : memref<16x128xf32, #tpu.memory_space<vmem>>, vector<16x128xf32>,
    return
  }
  func.func @transform_0(%arg0: i32, %arg1: i32) -> (i32, i32) {
    %c0_i32 = arith.constant 0 : i32
    %c0_i32_0 = arith.constant 0 : i32
    return %arg1, %c0_i32 : i32, i32
  }
  func.func @transform_1(%arg0: i32, %arg1: i32) -> (i32, i32) {
    %c0_i32 = arith.constant 0 : i32
    %c0_i32_0 = arith.constant 0 : i32
    return %c0_i32, %arg0 : i32, i32
  }
  func.func @transform_2(%arg0: i32, %arg1: i32) -> (i32, i32) {
    %c0_i32 = arith.constant 0 : i32
    %c0_i32_0 = arith.constant 0 : i32
    return %c0_i32, %arg0 : i32, i32
  }
  func.func @transform_3(%arg0: i32, %arg1: i32) -> (i32, i32) {
    %c0_i32 = arith.constant 0 : i32
    return %arg1, %arg0 : i32, i32
  }
}

</mosaic_0001>

<bundles_post_ra>
// kernel: tpu_custom_call.1
= control target key start
LH: loop header
LB: loop body
LE: loop exit
PB: predicated region body
PF: predicated region fallthrough
CT: control target
= control target key end

     0   :  { %6 = vsyncpa [#allocation3], 0  ;;  %s305_s0 = inlined_call_operand.hbm [shape: f32[8,128], index: 0, kind: input, shape index: {}]   ;;  %s306_s1 = inlined_call_operand.hbm [shape: f32[8,128], index: 1, kind: output, shape index: {}]  }
   0x1   :  { %7 = vsyncpa [#allocation4], 0  ;;  %s258_s6 = smov 0  }
   0x2 LB: > { %s145_s7 = sadd.s32 4294967295, %s244_s6   ;;  %p146_p0 = scmp.ge.s32.totalorder %s244_s6, 1  ;;  %s244_s6 = sphi %s258_s6, %s13_s6  }
   0x3   : > { %p60_p1 = scmp.lt.s32.totalorder %s244_s6, 3  ;;  %p270_p3 = scmp.eq.s32.totalorder %s145_s7, 0 }
   0x4   : > { %s246_s10 = smov [#allocation2]  }
   0x5   : > { %p266_p2 = pnand %p146_p0, %p60_p1  ;;  %s73_s11 = sshll.u32 %s246_s10, 4  ;;  %s74_s11 = int_to_ptr.vmem [resolvable:$true] %s73_s11 }
   0x6   : > { %s191_s12 = scalar_lea.vmem %s74_s11, 128  ;;  %p199_p10 = scmp.lt.s32.totalorder %s74_s11, %s74_s11 }
   0x7   : > { %p162_p4 = pneg %p266_p2  ;;  %p192_p7 = scmp.ne.s32.totalorder %s74_s11, %s191_s12 }
   0x8   : > { %p200_p11 = scmp.lt.s32.totalorder %s191_s12, %s191_s12 }
   0x9   : > { %p163_p5 = pnand %p270_p3, %p162_p4 }
   0xa   : > { %p201_p12 = por %p200_p11, %p199_p10 }
   0xb   : > { %p182_p6 = pneg %p163_p5 }
   0xd   : > { %p194_p8 = pnand %p192_p7, %p182_p6 }
   0xf   : > { %p195_p9 = pneg %p194_p8 }
  0x11   : > { %p202_p13 = pnand %p201_p12, %p195_p9 }
  0x13   : > { %205 = shalt.err (!%p202_p13)
}
  0x14   : > { %165 = dma.hbm_to_vmem [thread:$0]  (!%p163_p5), %s305_s0, 128, %s74_s11, [#allocation3]  }
  0x15   : > { %86 = sbr.rel (%p266_p2) target bundleno = 42 (0x2a), region = 24 }
  0x1a   : > { %235 = dma.done.wait (%p270_p3), [#allocation3], 128  }
  0x1b   : > { %237 = vsyncadd (%p270_p3), [#allocation3], 4294967168  ;;  %s247_s15 = smov [#allocation5]   ;;  %v96_v0 = vld [vmem:[#allocation2] sm:$0xff]  ;;  %p287_p0 = scmp.eq.s32.totalorder %s145_s7, 1 }
  0x1c   : > { %s106_s16 = sshll.u32 %s247_s15, 4  ;;  %v97_v1 = vadd.f32 1.0, %v96_v0  ;;  %s107_s16 = int_to_ptr.vmem [resolvable:$true] %s106_s16 }
  0x1d   : > { %s206_s18 = scalar_lea.vmem %s107_s16, 128  ;;  %p213_p5 = scmp.lt.s32.totalorder %s107_s16, %s107_s16 }
  0x1e   : > { %98 = vst [vmem:[#allocation5] sm:$0xff] %v97_v1  ;;  %p207_p1 = scmp.ne.s32.totalorder %s107_s16, %s206_s18  ;;  %p214_p6 = scmp.lt.s32.totalorder %s206_s18, %s206_s18 }
  0x20   : > { %p208_p2 = pnand %p207_p1, %p287_p0  ;;  %p215_p7 = por %p214_p6, %p213_p5 }
  0x22   : > { %p209_p4 = pneg %p208_p2 }
  0x24   : > { %p216_p3 = pnand %p215_p7, %p209_p4 }
  0x26   : > { %219 = shalt.err (!%p216_p3)
}
  0x27   : > { %159 = dma.vmem_to_hbm [thread:$0]  (%p287_p0), %s107_s16, 128, %s306_s1, [#allocation4]  }
  0x28   : > { %239 = dma.done.wait (%p287_p0), [#allocation4], 128  }
  0x29   : > { %241 = vsyncadd (%p287_p0), [#allocation4], 4294967168 }
  0x2a PF: > { %s13_s6 = sadd.s32 1, %s244_s6  }
  0x2b   : > { %p10_p8 = scmp.ge.s32.totalorder %s13_s6, 4  }
  0x2d   :  { %12 = sbr.rel (!%p10_p8) target bundleno = 2 (0x2), region = 53 }
  0x32   :  { %119 = vsyncpa [#allocation3], 1 }
  0x33   :  { %121 = vsyncpa [#allocation3 + $0x1], 1 }
  0x34   :  { %122 = vsyncpa [#allocation4], 1 }
  0x35   :  { %124 = vsyncpa [#allocation4 + $0x1], 1 }

// kernel: _conv2d_patch_embed_impl.1
= control target key start
LH: loop header
LB: loop body
LE: loop exit
PB: predicated region body
PF: predicated region fallthrough
CT: control target
= control target key end

     0   :  { %8 = vsyncpa [#allocation3], 0  ;;  %s820_s0 = inlined_call_operand.vmem [shape: bf16[32,128], index: 0, kind: input, shape index: {}]   ;;  %s821_s1 = inlined_call_operand.vmem [shape: bf16[128,128], index: 1, kind: input, shape index: {}]   ;;  %s822_s2 = inlined_call_operand.vmem [shape: f32[1,128], index: 2, kind: input, shape index: {}]   ;;  %s823_s3 = inlined_call_operand.hbm [shape: f32[32,128], index: 3, kind: output, shape index: {}]  }
   0x1   :  { %10 = vsyncpa [#allocation3 + $0x1], 0  ;;  %s680_s12 = smov 0   ;;  %s682_s13 = smov 0  }
   0x2   :  { %s684_s14 = smov 0   ;;  %s686_s15 = smov 0  }
   0x3   :  { %s688_s16 = smov 0   ;;  %s690_s17 = smov 0  }
   0x4 LB: > { %s454_s18 = sadd.s32 4294967295, %s653_s17   ;;  %s455_s19 = sadd.s32 4294967294, %s653_s17   ;;  %s653_s17 = sphi %s690_s17, %s16_s17   ;;  %s649_s16 = sphi %s688_s16, %s830_s16   ;;  %s645_s15 = sphi %s686_s15, %s829_s15   ;;  %s641_s14 = sphi %s684_s14, %s828_s14   ;;  %s637_s13 = sphi %s682_s13, %s827_s13   ;;  %s633_s12 = sphi %s680_s12, %s826_s12  }
   0x5   : > { %s25_s20 = sadd.s32 1, %s649_s16  ;;  %s115_s21 = sadd.s32 1, %s641_s14 }
   0x6   : > { %p26_p0 = scmp.ge.s32.totalorder %s25_s20, 2  ;;  %p125_p1 = scmp.ne.s32.totalorder %s641_s14, %s637_s13 }
   0x7   : > { %p126_p2 = scmp.eq.s32.totalorder %s454_s18, 1  ;;  %p131_p3 = scmp.ne.s32.totalorder %s637_s13, %s633_s12 }
   0x8   : > { %s832_s20 = smov (%p26_p0, %s25_s20), 0  ;;  %p132_p5 = scmp.eq.s32.totalorder %s455_s19, 1 }
   0x9   : > { %p720_p4 = por %p126_p2, %p125_p1  ;;  %s110_s23 = ssub.s32 %s649_s16, %s832_s20 }
   0xa   : > { %p460_p6 = scmp.ge.s32.totalorder %s653_s17, 1  ;;  %p113_p7 = scmp.eq.s32.totalorder %s110_s23, 0 }
   0xb   : > { %p727_p8 = por %p132_p5, %p131_p3  ;;  %p172_p9 = scmp.lt.s32.totalorder %s653_s17, 3 }
   0xc   : > { %s733_s25 = scalar_select %p113_p7, %s641_s14, %s115_s21  }
   0xd   : > { %p173_p10 = pnand %p460_p6, %p172_p9 }
   0xe   : > { %s462_s30 = sshll.u32 (!%p173_p10), %s645_s15, 1  ;;  %s479_s10 = sshll.u32 (!%p173_p10), %s645_s15, 8 }
   0xf   : > { %176 = sbr.rel (%p173_p10) target bundleno = 266 (0x10a), region = 32  ;;  %p204_p11 = scmp.lt.s32.totalorder (!%p173_p10), %s462_s30, 3 }
  0x10   : > { %s773_s18 = scalar_lea.hbm (!%p173_p10), %s823_s3, %s479_s10  ;;  %s657_s15 = smov (!%p173_p10), [#allocation2]  }
  0x11   : > { %s581_s23 = sshll.u32 (!%p173_p10), %s657_s15, 4  ;;  %s582_s23 = int_to_ptr.vmem [resolvable:$false] %s581_s23 }
  0x12   : > { %s583_s26 = scalar_lea.vmem (!%p173_p10), %s582_s23, 512 }
  0x14   : > { %v568_v0 = vld [vmem:[%s821_s1 + $0x38] sm:$0xff]   ;;  %v655_v1 = vmov 0.0   ;;  %v569_v2 = vld [vmem:[%s821_s1 + $0x30] sm:$0xff]   ;;  %vm656_vm0 = vmmov 0   ;;  %s834_s30 = smov (!%p204_p11, %s462_s30), 3  ;;  %v570_v3 = vld [vmem:[%s821_s1 + $0x28] sm:$0xff]  }
  0x15   : > { %489 = vmatprep.subr.bf16.mxu0 %v655_v1  ;;  %505 = vmatprep.mubr.msk.bf16.mxu0 %vm656_vm0, %v655_v1  ;;  %s463_s6 = sshll.u32 %s834_s30, 2  ;;  %v571_v4 = vld [vmem:[%s821_s1 + $0x20] sm:$0xff]   ;;  %v572_v5 = vld [vmem:[%s821_s1 + $0x18] sm:$0xff]   ;;  %v573_v6 = vld [vmem:[%s821_s1 + $0x10] sm:$0xff]   ;;  %s200_s30 = sand.u32 1, %s637_s13  }
  0x16   : > { %490 = vmatpush3.bf16.msra.mxu0 %v568_v0  ;;  %s207_s9 = scalar_lea.vmem %s820_s0, %s463_s6  ;;  %v574_v7 = vld [vmem:[%s821_s1 + $0x8] sm:$0xff]   ;;  %v575_v8 = vld [vmem:[%s821_s1] sm:$0xff]   ;;  %s461_s4 = sshll.u32 %s200_s30, 4 }
  0x17   : > { %491 = vmatprep.subr.bf16.mxu0 %v655_v1  ;;  %v576_v9 = vld [vmem:[%s207_s9] sm:$0xff]   ;;  %s202_s7 = scalar_lea.vmem [#allocation2], %s461_s4  ;;  %s775_s19 = scalar_lea.sflag [#allocation3], %s200_s30 }
  0x18   : > { %v464_v10 = vld [vmem:[%s822_s2] ss:$0 sm:$0xff]  ;;  %s355_s8 = sshll.u32 %s202_s7, 4  ;;  %s768_s8 = int_to_ptr.vmem [resolvable:$true] %s355_s8 }
  0x19   : > { %s577_s21 = scalar_lea.vmem %s768_s8, 256  ;;  %p584_p1 = scmp.lt.s32.totalorder %s768_s8, %s582_s23 }
  0x1a   : > { %492 = vmatpush3.bf16.msra.mxu0 %v569_v2  ;;  %p578_p12 = scmp.ne.s32.totalorder %s768_s8, %s577_s21  ;;  %p585_p2 = scmp.lt.s32.totalorder %s583_s26, %s577_s21 }
  0x1b   : > { %493 = vmatprep.subr.bf16.mxu0 %v655_v1 }
  0x1c   : > { %p579_p13 = pnand %p578_p12, %p720_p4  ;;  %p586_p3 = por %p585_p2, %p584_p1 }
  0x1e   : > { %494 = vmatpush3.bf16.msra.mxu0 %v570_v3  ;;  %p580_p0 = pneg %p579_p13 }
  0x1f   : > { %495 = vmatprep.subr.bf16.mxu0 %v655_v1 }
  0x20   : > { %p587_p5 = pnand %p586_p3, %p580_p0 }
  0x22   : > { %496 = vmatpush3.bf16.msra.mxu0 %v571_v4 }
  0x23   : > { %497 = vmatprep.subr.bf16.mxu0 %v655_v1 }
  0x26   : > { %498 = vmatpush3.bf16.msra.mxu0 %v572_v5 }
  0x27   : > { %499 = vmatprep.subr.bf16.mxu0 %v655_v1 }
  0x2a   : > { %500 = vmatpush3.bf16.msra.mxu0 %v573_v6 }
  0x2b   : > { %501 = vmatprep.subr.bf16.mxu0 %v655_v1 }
  0x2e   : > { %502 = vmatpush3.bf16.msra.mxu0 %v574_v7 }
  0x2f   : > { %503 = vmatprep.subr.bf16.mxu0 %v655_v1 }
  0x32   : > { %504 = vmatpush3.bf16.msra.mxu0 %v575_v8 }
  0x35   : > { %506 = vmatmul.mubr.bf16.vlgmr.msra.gmra.mxu0 %v576_v9 }
  0xf5   : > { %v331_v11 = vpop.f32.mrf.mxu0 }
  0xf6   : > { %v332_v12 = vadd.f32 %v464_v10, %v331_v11 }
  0xf7   : > { %v507_v13 = vpop.f32.mrf.mxu0 }
  0xf8   : > { %338 = vst [vmem:[%s202_s7] sm:$0xff] %v332_v12 }
  0xf9   : > { %v334_v14 = vpop.f32.mrf.mxu0 }
  0xfa   : > { %v335_v15 = vadd.f32 %v464_v10, %v334_v14 }
  0xfb   : > { %v508_v16 = vpop.f32.mrf.mxu0 }
  0xfc   : > { %339 = vst [vmem:[%s202_s7 + $0x8] sm:$0xff] %v335_v15 }
  0xfd   : > { %590 = shalt.err (!%p587_p5)
}
  0xfe   : > { %s591_s27 = scalar_lea.hbm %s773_s18, 256  ;;  %s595_s30 = scalar_lea.hbm %s823_s3, 512 }
  0xff   : > { %p592_p6 = scmp.ne.s32.totalorder %s773_s18, %s591_s27  ;;  %p596_p10 = scmp.lt.s32.totalorder %s773_s18, %s823_s3 }
 0x100   : > { %p597_p11 = scmp.lt.s32.totalorder %s595_s30, %s591_s27 }
 0x101   : > { %p593_p7 = pnand %p592_p6, %p720_p4 }
 0x102   : > { %p598_p12 = por %p597_p11, %p596_p10 }
 0x103   : > { %p594_p9 = pneg %p593_p7 }
 0x105   : > { %p599_p13 = pnand %p598_p12, %p594_p9 }
 0x107   : > { %602 = shalt.err (!%p599_p13)
}
 0x108   : > { %s658_s6 = smov 128   ;;  %s659_s7 = smov 8  }
 0x109   : > { %509 = dma.vmem_to_hbm [thread:$0]  (%p720_p4), %s768_s8, 256, %s773_s18, %s775_s19, %s658_s6, %s658_s6, %s659_s7  }
 0x10a PF: > { %p515_p0 = scmp.ge.s32.totalorder %s653_s17, 2  ;;  %s370_s10 = sand.u32 1, %s633_s12  }
 0x10b   : > { %s371_s9 = scalar_lea.sflag [#allocation3], %s370_s10 }
 0x10c   : > { %p512_p1 = pnand %p515_p0, %p727_p8 }
 0x10e   : > { %p513_p2 = pneg %p512_p1 }
 0x110   : > { %628 = dma.done.wait (%p513_p2), %s371_s9, 256  }
 0x111   : > { %630 = vsyncadd (%p513_p2), %s371_s9, 4294967040  ;;  %s16_s17 = sadd.s32 1, %s653_s17   ;;  %s826_s12 = smov %s637_s13 }
 0x112   : > { %p13_p3 = scmp.ge.s32.totalorder %s16_s17, 4   ;;  %s827_s13 = smov %s641_s14 }
 0x113   : > { %s828_s14 = smov %s733_s25  ;;  %s829_s15 = smov %s649_s16 }
 0x114   : > { %s830_s16 = smov %s832_s20  ;;  %15 = sbr.rel (!%p13_p3) target bundleno = 4 (0x4), region = 73 }
 0x119   :  { %376 = vsyncpa [#allocation3], 1 }
 0x11a   :  { %378 = vsyncpa [#allocation3 + $0x1], 1 }

</bundles_post_ra>
